<compile_context>
chip_gen: v6e
topology: v6e:2x2x1
jax: 0.10.0
libtpu: 0.0.40
codegen_flags: <defaults>
</compile_context>

<pallas_src>
import numpy as np
import jax
import jax.numpy as jnp
from jax.experimental import pallas as pl
from jax.experimental.pallas import tpu as pltpu


# ----------------------------- Pallas kernels -----------------------------

def _linear_kernel(x_ref, w_ref, o_ref, acc_ref):
    @pl.when(pl.program_id(2) == 0)
    def _():
        acc_ref[...] = jnp.zeros_like(acc_ref)

    acc_ref[...] += jnp.dot(x_ref[...], w_ref[...],
                            preferred_element_type=jnp.float32)

    @pl.when(pl.program_id(2) == pl.num_programs(2) - 1)
    def _():
        o_ref[...] = acc_ref[...].astype(o_ref.dtype)


def _linear_bias_kernel(x_ref, w_ref, b_ref, o_ref, acc_ref):
    @pl.when(pl.program_id(2) == 0)
    def _():
        acc_ref[...] = jnp.zeros_like(acc_ref)

    acc_ref[...] += jnp.dot(x_ref[...], w_ref[...],
                            preferred_element_type=jnp.float32)

    @pl.when(pl.program_id(2) == pl.num_programs(2) - 1)
    def _():
        o_ref[...] = (acc_ref[...] + b_ref[...]).astype(o_ref.dtype)


# ----------------------------- Host wrapper --------------------------------

def _round_up(x, m):
    return (x + m - 1) // m * m


def linear_norm(x, weight, bias=None, *, tm_max=256, tn_max=256, tk_max=512):
    """LinearNorm forward: y = x @ weight (+ bias).

    x:      (..., in_features)
    weight: (in_features, out_features)
    bias:   (out_features,) or None
    """
    *lead, K = x.shape
    Kw, N = weight.shape
    assert K == Kw, "in_features mismatch"
    M = int(np.prod(lead)) if lead else 1
    x2d = x.reshape(M, K)

    # Tile sizes aligned to the (8, 128) sublane/lane tiling, clamped to the
    # (padded) problem size so tiny problems do not over-allocate VMEM.
    tm = min(tm_max, _round_up(M, 8))
    tn = min(tn_max, _round_up(N, 128))
    tk = min(tk_max, _round_up(K, 128))

    # Pad so every tile is full; zero padding along K keeps the reduction
    # exact, padded rows/cols are sliced off at the end.
    Mp, Np, Kp = _round_up(M, tm), _round_up(N, tn), _round_up(K, tk)
    xp = jnp.pad(x2d, ((0, Mp - M), (0, Kp - K)))
    wp = jnp.pad(weight, ((0, Kp - K), (0, Np - N)))

    grid = (Mp // tm, Np // tn, Kp // tk)

    in_specs = [pl.BlockSpec((tm, tk), lambda i, j, k: (i, k)),
                pl.BlockSpec((tk, tn), lambda i, j, k: (k, j))]
    operands = [xp, wp]
    if bias is not None:
        bp = jnp.pad(bias.reshape(1, N), ((0, 0), (0, Np - N)))
        in_specs.append(pl.BlockSpec((1, tn), lambda i, j, k: (0, j)))
        operands.append(bp)
        kernel = _linear_bias_kernel
    else:
        kernel = _linear_kernel

    # Explicit VMEM budget: double-buffered inputs + output + f32 accumulator
    # (in bytes), with headroom; clamped so it is valid on v5e/v6e/v7x.
    vmem_budget = 4 * (2 * (tm * tk + tk * tn + tn) + 3 * tm * tn) + (1 << 20)
    vmem_budget = int(min(max(vmem_budget, 8 << 20), 32 << 20))

    out = pl.pallas_call(
        kernel,
        out_shape=jax.ShapeDtypeStruct((Mp, Np), x.dtype),
        grid_spec=pltpu.PrefetchScalarGridSpec(
            num_scalar_prefetch=0,
            grid=grid,
            in_specs=in_specs,
            out_specs=pl.BlockSpec((tm, tn), lambda i, j, k: (i, j)),
            scratch_shapes=[pltpu.VMEM((tm, tn), jnp.float32)]),
        compiler_params=pltpu.CompilerParams(
            dimension_semantics=("parallel", "parallel", "arbitrary"),
            vmem_limit_bytes=vmem_budget),
    )(*operands)

    return out[:M, :N].reshape(*lead, N)


# ----------------------------- Param init ----------------------------------

def init_linear_norm_params(key, in_features, out_features, bias=False):
    bound = float(np.sqrt(6.0 / (in_features + out_features)))   # xavier_uniform
    params = {
        "weight": jax.random.uniform(key, (in_features, out_features),
                                     jnp.float32, -bound, bound),
    }
    if bias:
        params["bias"] = jnp.zeros((out_features,), jnp.float32)  # constant_(0.0)
    return params


# ----------------------------------- main ----------------------------------

if __name__ == "__main__":
    root = jax.random.PRNGKey(0)
    k_param, k_x, k_param2, k_x2 = jax.random.split(root, 4)

    # Small shapes consistent with the module's forward: (B, L, in_features).
    B, L, IN_F, OUT_F = 2, 8, 32, 64
    params = init_linear_norm_params(k_param, IN_F, OUT_F, bias=False)
    x = jax.random.normal(k_x, (B, L, IN_F), jnp.float32)

    out = linear_norm(x, params["weight"])
    jax.block_until_ready(out)

    ref = jnp.einsum("blk,kn->bln", x, params["weight"])
    assert out.shape == (B, L, OUT_F)
    assert bool(jnp.all(jnp.isfinite(out)))
    assert bool(jnp.allclose(out, ref, atol=1e-5, rtol=1e-5))

    # Second case exercising multi-tile grid (M, N, K not tile-sized) + bias.
    B2, L2, IN2, OUT2 = 4, 96, 384, 320
    params2 = init_linear_norm_params(k_param2, IN2, OUT2, bias=True)
    x2 = jax.random.normal(k_x2, (B2, L2, IN2), jnp.float32)

    out2 = linear_norm(x2, params2["weight"], params2["bias"])
    jax.block_until_ready(out2)

    ref2 = jnp.einsum("blk,kn->bln", x2, params2["weight"]) + params2["bias"]
    assert out2.shape == (B2, L2, OUT2)
    assert bool(jnp.allclose(out2, ref2, atol=1e-4, rtol=1e-4))

    print("KERNEL_OK")
</pallas_src>

<mosaic_0001>
module attributes {stable_mosaic.version = 11 : i64} {
  func.func @_linear_kernel(%arg0: i32, %arg1: i32, %arg2: i32, %arg3: memref<16x128xf32, #tpu.memory_space<vmem>>, %arg4: memref<128x128xf32, #tpu.memory_space<vmem>>, %arg5: memref<16x128xf32, #tpu.memory_space<vmem>>, %arg6: memref<16x128xf32, #tpu.memory_space<vmem>>) attributes {dimension_semantics = [#tpu.dimension_semantics<parallel>, #tpu.dimension_semantics<parallel>, #tpu.dimension_semantics<arbitrary>], iteration_bounds = array<i64: 1, 1, 1>, scalar_prefetch = 0 : i64, scratch_operands = 1 : i64, tpu.core_type = #tpu.core_type<tc>, window_params = [{transform_indices = @transform_0, window_bounds = array<i64: 16, 128>}, {transform_indices = @transform_1, window_bounds = array<i64: 128, 128>}, {transform_indices = @transform_2, window_bounds = array<i64: 16, 128>}]} {
    %c0_i32 = arith.constant 0 : i32
    %0 = arith.cmpi eq, %arg2, %c0_i32 : i32
    %1 = arith.extui %0 : i1 to i32
    %c0_i32_0 = arith.constant 0 : i32
    %2 = arith.cmpi ne, %1, %c0_i32_0 : i32
    scf.if %2 {
      %cst_10 = arith.constant 0.000000e+00 : f32
      %12 = vector.broadcast %cst_10 : f32 to vector<16x128xf32>
      %c0_11 = arith.constant 0 : index
      %c0_12 = arith.constant 0 : index
      %13 = vector.load %arg6[%c0_11, %c0_12] : memref<16x128xf32, #tpu.memory_space<vmem>>, vector<16x128xf32>
      tpu.vector_store %arg6[%c0_11, %c0_12], %12 {strides = array<i32>} : memref<16x128xf32, #tpu.memory_space<vmem>>, vector<16x128xf32>,
    } else {
    }
    %c0 = arith.constant 0 : index
    %c0_1 = arith.constant 0 : index
    %3 = vector.load %arg6[%c0, %c0_1] : memref<16x128xf32, #tpu.memory_space<vmem>>, vector<16x128xf32>
    %c0_2 = arith.constant 0 : index
    %c0_3 = arith.constant 0 : index
    %4 = vector.load %arg3[%c0_2, %c0_3] : memref<16x128xf32, #tpu.memory_space<vmem>>, vector<16x128xf32>
    %c0_4 = arith.constant 0 : index
    %c0_5 = arith.constant 0 : index
    %5 = vector.load %arg4[%c0_4, %c0_5] : memref<128x128xf32, #tpu.memory_space<vmem>>, vector<128x128xf32>
    %cst = arith.constant dense<0.000000e+00> : vector<16x128xf32>
    %6 = tpu.matmul %4, %5, %cst {dimension_numbers = #tpu.dot_dimension_numbers<[1], [0], [0], [1], [0, 0, 1, 1], [], []>} : vector<16x128xf32>, vector<128x128xf32>, vector<16x128xf32> -> vector<16x128xf32>
    %7 = arith.addf %3, %6 : vector<16x128xf32>
    %c0_6 = arith.constant 0 : index
    %c0_7 = arith.constant 0 : index
    %8 = vector.load %arg6[%c0_6, %c0_7] : memref<16x128xf32, #tpu.memory_space<vmem>>, vector<16x128xf32>
    tpu.vector_store %arg6[%c0_6, %c0_7], %7 {strides = array<i32>} : memref<16x128xf32, #tpu.memory_space<vmem>>, vector<16x128xf32>,
    %c0_i32_8 = arith.constant 0 : i32
    %9 = arith.cmpi eq, %arg2, %c0_i32_8 : i32
    %10 = arith.extui %9 : i1 to i32
    %c0_i32_9 = arith.constant 0 : i32
    %11 = arith.cmpi ne, %10, %c0_i32_9 : i32
    scf.if %11 {
      %c0_10 = arith.constant 0 : index
      %c0_11 = arith.constant 0 : index
      %12 = vector.load %arg6[%c0_10, %c0_11] : memref<16x128xf32, #tpu.memory_space<vmem>>, vector<16x128xf32>
      %c0_12 = arith.constant 0 : index
      %c0_13 = arith.constant 0 : index
      %13 = vector.load %arg5[%c0_12, %c0_13] : memref<16x128xf32, #tpu.memory_space<vmem>>, vector<16x128xf32>
      tpu.vector_store %arg5[%c0_12, %c0_13], %12 {strides = array<i32>} : memref<16x128xf32, #tpu.memory_space<vmem>>, vector<16x128xf32>,
    } else {
    }
    return
  }
  func.func @transform_0(%arg0: i32, %arg1: i32, %arg2: i32) -> (i32, i32) {
    %c0_i32 = arith.constant 0 : i32
    return %arg0, %arg2 : i32, i32
  }
  func.func @transform_1(%arg0: i32, %arg1: i32, %arg2: i32) -> (i32, i32) {
    %c0_i32 = arith.constant 0 : i32
    return %arg2, %arg1 : i32, i32
  }
  func.func @transform_2(%arg0: i32, %arg1: i32, %arg2: i32) -> (i32, i32) {
    %c0_i32 = arith.constant 0 : i32
    return %arg0, %arg1 : i32, i32
  }
}

</mosaic_0001>

<bundles_post_ra>
// kernel: tpu_custom_call.1
= control target key start
LH: loop header
LB: loop body
LE: loop exit
PB: predicated region body
PF: predicated region fallthrough
CT: control target
= control target key end

     0   :  { %7 = vsyncpa [#allocation4], 0  ;;  %s332_s0 = inlined_call_operand.hbm [shape: f32[16,128], index: 0, kind: input, shape index: {}]   ;;  %s333_s1 = inlined_call_operand.hbm [shape: f32[128,128], index: 1, kind: input, shape index: {}]   ;;  %s334_s2 = inlined_call_operand.hbm [shape: f32[16,128], index: 2, kind: output, shape index: {}]  }
   0x1   :  { %8 = vsyncpa [#allocation7], 0 }
   0x2   :  { %9 = vsyncpa [#allocation5], 0  ;;  %s294_s9 = smov [#allocation3]  }
   0x3   :  { %s15_s10 = sshll.u32 %s294_s9, 4  ;;  %s16_s10 = int_to_ptr.vmem [resolvable:$true] %s15_s10 }
   0x4   :  { %s236_s11 = scalar_lea.vmem %s16_s10, 256  ;;  %p241_p1 = scmp.lt.s32.totalorder %s16_s10, %s16_s10 }
   0x5   :  { %p237_p0 = scmp.ne.s32.totalorder %s16_s10, %s236_s11  ;;  %p242_p2 = scmp.lt.s32.totalorder %s236_s11, %s236_s11 }
   0x7   :  { %p243_p3 = por %p242_p2, %p241_p1 }
   0x9   :  { %p244_p4 = pnand %p243_p3, %p237_p0 }
   0xb   :  { %247 = shalt.err (!%p244_p4)
}
   0xc   :  { %s295_s12 = smov 128   ;;  %s296_s13 = smov 8  }
   0xd   :  { %21 = dma.hbm_to_vmem [thread:$0]  %s332_s0, 256, %s16_s10, [#allocation4], %s295_s12, %s295_s12, %s296_s13  }
   0xe   :  { %s297_s16 = smov [#allocation6]  }
   0xf   :  { %s27_s17 = sshll.u32 %s297_s16, 4  ;;  %s28_s17 = int_to_ptr.vmem [resolvable:$true] %s27_s17 }
  0x10   :  { %s256_s18 = scalar_lea.vmem %s28_s17, 2048  ;;  %p261_p6 = scmp.lt.s32.totalorder %s28_s17, %s28_s17 }
  0x11   :  { %p257_p5 = scmp.ne.s32.totalorder %s28_s17, %s256_s18  ;;  %p262_p7 = scmp.lt.s32.totalorder %s256_s18, %s256_s18 }
  0x13   :  { %p263_p8 = por %p262_p7, %p261_p6 }
  0x15   :  { %p264_p9 = pnand %p263_p8, %p257_p5 }
  0x17   :  { %267 = shalt.err (!%p264_p9)
}
  0x18   :  { %33 = dma.hbm_to_vmem [thread:$0]  %s333_s1, 2048, %s28_s17, [#allocation7], %s295_s12, %s295_s12, %s296_s13  }
  0x19   :  { %288 = dma.done.wait [#allocation4], 256  }
  0x1a   :  { %289 = vsyncadd [#allocation4], 4294967040 }
  0x1b   :  { %290 = dma.done.wait [#allocation7], 2048  }
  0x1c   :  { %291 = vsyncadd [#allocation7], 4294965248  ;;  %v65_v0 = vld [vmem:[#allocation6 + $0x78] sm:$0xff]  ;;  %v64_v1 = vld [vmem:[#allocation6 + $0x70] sm:$0xff]  ;;  %s298_s0 = smov [#allocation8]  }
  0x1d   :  { %188 = vmatprep.subr.mxu0 %v65_v0  ;;  %v63_v2 = vld [vmem:[#allocation6 + $0x68] sm:$0xff]  ;;  %v62_v3 = vld [vmem:[#allocation6 + $0x60] sm:$0xff]  ;;  %v48_v4 = vld [vmem:[#allocation3] sm:$0xff]  ;;  %s157_s1 = sshll.u32 %s298_s0, 4  ;;  %s158_s1 = int_to_ptr.vmem [resolvable:$true] %s157_s1 }
  0x1e   :  { %189 = vmatpush3.msra.mxu0 %v65_v0  ;;  %v61_v5 = vld [vmem:[#allocation6 + $0x58] sm:$0xff]  ;;  %220 = vmatprep.mubr.f32.mxu0 %v48_v4  ;;  %v60_v6 = vld [vmem:[#allocation6 + $0x50] sm:$0xff]  ;;  %v59_v7 = vld [vmem:[#allocation6 + $0x48] sm:$0xff]  ;;  %s268_s21 = scalar_lea.vmem %s158_s1, 256  ;;  %p273_p11 = scmp.lt.s32.totalorder %s158_s1, %s158_s1 }
  0x1f   :  { %190 = vmatprep.subr.mxu0 %v64_v1  ;;  %v58_v8 = vld [vmem:[#allocation6 + $0x40] sm:$0xff]  ;;  %v57_v9 = vld [vmem:[#allocation6 + $0x38] sm:$0xff]  ;;  %v56_v10 = vld [vmem:[#allocation6 + $0x30] sm:$0xff]  ;;  %p269_p10 = scmp.ne.s32.totalorder %s158_s1, %s268_s21  ;;  %p274_p12 = scmp.lt.s32.totalorder %s268_s21, %s268_s21 }
  0x20   :  { %191 = vmatpush3.msra.mxu0 %v64_v1  ;;  %v55_v11 = vld [vmem:[#allocation6 + $0x28] sm:$0xff]  ;;  %v54_v12 = vld [vmem:[#allocation6 + $0x20] sm:$0xff]  ;;  %v53_v13 = vld [vmem:[#allocation6 + $0x18] sm:$0xff] }
  0x21   :  { %192 = vmatprep.subr.mxu0 %v63_v2  ;;  %v52_v14 = vld [vmem:[#allocation6 + $0x10] sm:$0xff]  ;;  %v51_v15 = vld [vmem:[#allocation6 + $0x8] sm:$0xff]  ;;  %v50_v16 = vld [vmem:[#allocation6] sm:$0xff]  ;;  %p275_p13 = por %p274_p12, %p273_p11 }
  0x22   :  { %193 = vmatpush3.msra.mxu0 %v63_v2  ;;  %v49_v17 = vld [vmem:[#allocation3 + $0x8] sm:$0xff] }
  0x23   :  { %194 = vmatprep.subr.mxu0 %v62_v3  ;;  %p276_p0 = pnand %p275_p13, %p269_p10 }
  0x24   :  { %195 = vmatpush3.msra.mxu0 %v62_v3 }
  0x25   :  { %196 = vmatprep.subr.mxu0 %v61_v5 }
  0x26   :  { %197 = vmatpush3.msra.mxu0 %v61_v5 }
  0x27   :  { %198 = vmatprep.subr.mxu0 %v60_v6 }
  0x28   :  { %199 = vmatpush3.msra.mxu0 %v60_v6 }
  0x29   :  { %200 = vmatprep.subr.mxu0 %v59_v7 }
  0x2a   :  { %201 = vmatpush3.msra.mxu0 %v59_v7 }
  0x2b   :  { %202 = vmatprep.subr.mxu0 %v58_v8 }
  0x2c   :  { %203 = vmatpush3.msra.mxu0 %v58_v8 }
  0x2d   :  { %204 = vmatprep.subr.mxu0 %v57_v9 }
  0x2e   :  { %205 = vmatpush3.msra.mxu0 %v57_v9 }
  0x2f   :  { %206 = vmatprep.subr.mxu0 %v56_v10 }
  0x30   :  { %207 = vmatpush3.msra.mxu0 %v56_v10 }
  0x31   :  { %208 = vmatprep.subr.mxu0 %v55_v11 }
  0x32   :  { %209 = vmatpush3.msra.mxu0 %v55_v11 }
  0x33   :  { %210 = vmatprep.subr.mxu0 %v54_v12 }
  0x34   :  { %211 = vmatpush3.msra.mxu0 %v54_v12 }
  0x35   :  { %212 = vmatprep.subr.mxu0 %v53_v13 }
  0x36   :  { %213 = vmatpush3.msra.mxu0 %v53_v13 }
  0x37   :  { %214 = vmatprep.subr.mxu0 %v52_v14 }
  0x38   :  { %215 = vmatpush3.msra.mxu0 %v52_v14 }
  0x39   :  { %216 = vmatprep.subr.mxu0 %v51_v15 }
  0x3a   :  { %217 = vmatpush3.msra.mxu0 %v51_v15 }
  0x3b   :  { %218 = vmatprep.subr.mxu0 %v50_v16 }
  0x3c   :  { %219 = vmatpush3.msra.mxu0 %v50_v16 }
  0x3d   :  { %221 = vmatmul.mubr.f32.vlgmr.msra.gmra.mxu0 %v49_v17 }
  0xfd   :  { %v222_v18 = vpop.f32.mrf.mxu0 }
  0xfe   :  { %151 = vst [vmem:[#allocation8 + $0x8] sm:$0xff] %v222_v18 }
  0xff   :  { %v132_v19 = vpop.f32.mrf.mxu0 }
 0x100   :  { %150 = vst [vmem:[#allocation8] sm:$0xff] %v132_v19 }
 0x101   :  { %279 = shalt.err (!%p276_p0)
}
 0x102   :  { %163 = dma.vmem_to_hbm [thread:$0]  %s158_s1, 256, %s334_s2, [#allocation5], %s295_s12, %s295_s12, %s296_s13  }
 0x103   :  { %292 = dma.done.wait [#allocation5], 256  }
 0x104   :  { %293 = vsyncadd [#allocation5], 4294967040 }
 0x105   :  { %167 = vsyncpa [#allocation4], 1 }
 0x106   :  { %168 = vsyncpa [#allocation7], 1 }
 0x107   :  { %169 = vsyncpa [#allocation5], 1 }

</bundles_post_ra>
